<compile_context>
chip_gen: v7x
topology: tpu7x:2x2x1
jax: 0.10.0
libtpu: 0.0.40
codegen_flags: <defaults>
</compile_context>

<pallas_src>
import functools

import jax
import jax.numpy as jnp
from jax.experimental import pallas as pl
from jax.experimental.pallas import tpu as pltpu

LANE = 128
SUBLANE = 8
BF16_SUBLANE = 16


def _rup(x, m):
    return ((x + m - 1) // m) * m


def _pad2(x, rows, cols, dtype):
    out = jnp.zeros((rows, cols), dtype)
    return out.at[: x.shape[0], : x.shape[1]].set(x.astype(dtype))


def _pad_split_cols(x, rows, half_cols, h, dtype):
    """[R, 2h] -> [rows, 2*half_cols]; each h-wide half lands in its own lane slab."""
    out = jnp.zeros((rows, 2 * half_cols), dtype)
    out = out.at[: x.shape[0], :h].set(x[:, :h].astype(dtype))
    out = out.at[: x.shape[0], half_cols : half_cols + h].set(x[:, h:].astype(dtype))
    return out


def _pad_split_rows(x, half_rows, h, cols, dtype):
    """[2h, C] -> [2*half_rows, cols]; each h-tall half lands in its own row slab."""
    out = jnp.zeros((2 * half_rows, cols), dtype)
    out = out.at[:h, : x.shape[1]].set(x[:h, :].astype(dtype))
    out = out.at[half_rows : half_rows + h, : x.shape[1]].set(x[h:, :].astype(dtype))
    return out


def _vmem_budget_bytes():
    try:
        cap = int(pltpu.get_tpu_info().vmem_capacity_bytes)
    except Exception:
        cap = 64 * 1024 * 1024  # conservative fallback (v7x per-TC VMEM)
    return max(32 * 1024 * 1024, int(cap * 0.85))


def _vmem_bytes(tm, n0p, n1p, n2p, f0p, hp, cp):
    """Rough VMEM footprint of the fused phase-2/3 kernel (single-buffer residents)."""
    bf, f4 = 2, 4
    resident = ((n0p * hp) + (hp * hp) + (2 * hp * cp)) * bf + SUBLANE * (hp + cp) * f4
    streamed = 2 * ((tm * n0p) + (tm * hp) + (tm * 2 * hp)) * bf   # 2 pipeline buffers
    scratch = ((n1p * 2 * hp) + (n2p * n1p) + (n2p * 2 * hp)) * bf
    outb = 2 * max(n2p, SUBLANE) * cp * f4
    return resident + streamed + scratch + outb


# ---------------------------------------------------------------------------
# Phase 1: hm0 = relu(X0 @ W0 + b0) - hist_0   (tiled over source nodes)
# ---------------------------------------------------------------------------
def _hm0_kernel(x0_ref, w0_ref, b0_ref, hist0_ref, hm0_ref):
    h0 = jnp.dot(x0_ref[...], w0_ref[...], preferred_element_type=jnp.float32)
    h0 = jnp.maximum(h0 + b0_ref[...], 0.0)
    hm0_ref[...] = (h0 - hist0_ref[...].astype(jnp.float32)).astype(jnp.bfloat16)


# ---------------------------------------------------------------------------
# Phase 2 + 3 fused.  Grid = (n1p // tm,) over dst tiles of the layer-0
# aggregation; phase-2 results stay in a VMEM (n1p, 2*hp) scratch; phase 3
# runs at the last step on A1 / agg_h_1 that were DMA'd manually starting at
# step 0 (overlapped with the whole phase-2 stream).
# ---------------------------------------------------------------------------
def _fused_kernel(
    hm0_ref,                      # (n0p, hp)  bf16, resident
    a0_ref,                       # (tm, n0p)  bf16, dst-tiled (pipelined)
    aggh0_ref,                    # (tm, hp)   bf16, dst-tiled
    hist1_ref,                    # (tm, 2hp)  bf16, dst-tiled (merged halves)
    w1_ref, b1_ref,               # resident
    a1_hbm, aggh1_hbm,            # HBM refs (pl.ANY) -> manual DMA
    w2_ref, b2_ref,               # resident (merged W2, bias)
    out_ref,                      # (n2p, cp)  f32, lane-dense
    hm1_s,                        # (n1p, 2hp) bf16 scratch (persists across grid)
    a1_s, aggh1_s,                # VMEM landing buffers for the manual DMA
    dma_sems,                     # SemaphoreType.DMA((2,))
    *, tm, hp):
    i = pl.program_id(0)
    last = pl.num_programs(0) - 1

    # Kick off the phase-3 operand transfers early so they overlap phase 2.
    @pl.when(i == 0)
    def _():
        pltpu.make_async_copy(a1_hbm, a1_s, dma_sems.at[0]).start()
        pltpu.make_async_copy(aggh1_hbm, aggh1_s, dma_sems.at[1]).start()

    # ---- phase 2: layer-0 NodeUpdate for this dst tile ----------------------
    agg0 = jnp.dot(a0_ref[...], hm0_ref[...], preferred_element_type=jnp.float32)
    h2 = agg0 + aggh0_ref[...].astype(jnp.float32)
    y1 = jnp.dot(h2.astype(jnp.bfloat16), w1_ref[...],
                 preferred_element_type=jnp.float32) + b1_ref[...]

    hist1a = hist1_ref[:, pl.ds(0, hp)].astype(jnp.float32)
    hist1b = hist1_ref[:, pl.ds(hp, hp)].astype(jnp.float32)
    row = pl.multiple_of(i * tm, tm)
    # concat(y1, relu(y1)) kept as two tile-aligned column ranges of one slab;
    # layer-1 history subtracted here so phase 3 reads MXU-ready bf16 operands.
    hm1_s[pl.ds(row, tm), pl.ds(0, hp)] = (y1 - hist1a).astype(jnp.bfloat16)
    hm1_s[pl.ds(row, tm), pl.ds(hp, hp)] = (
        jnp.maximum(y1, 0.0) - hist1b).astype(jnp.bfloat16)

    # ---- phase 3: layer-1 NodeUpdate over all output nodes (last step) ------
    @pl.when(i == last)
    def _():
        pltpu.make_async_copy(a1_hbm, a1_s, dma_sems.at[0]).wait()
        pltpu.make_async_copy(aggh1_hbm, aggh1_s, dma_sems.at[1]).wait()
        agg1 = jnp.dot(a1_s[...], hm1_s[...], preferred_element_type=jnp.float32)
        z = (agg1 + aggh1_s[...].astype(jnp.float32)).astype(jnp.bfloat16)
        out = jnp.dot(z, w2_ref[...], preferred_element_type=jnp.float32)
        out_ref[...] = out + b2_ref[...]


# ---------------------------------------------------------------------------
# Wrapper: pads to lane-dense shapes, casts streamed operands to bf16, derives
# a per-generation tile size / VMEM budget, runs the two pallas_calls.
# ---------------------------------------------------------------------------
def gcn_sampling_forward(params, nf, *, tm=256):
    feat0 = nf["feat0"]
    adj0, adj1 = nf["adj"]
    hist0, hist1 = nf["hist"]
    aggh0, aggh1 = nf["agg_hist"]
    w0, b0 = params["W0"], params["b0"]
    w1, b1 = params["layers_W"][0], params["layers_b"][0]
    w2, b2 = params["layers_W"][1], params["layers_b"][1]

    n0, f0 = feat0.shape
    h = w0.shape[1]
    c = w2.shape[1]
    n1 = adj0.shape[0]
    n2 = adj1.shape[0]

    f0p, hp, cp = _rup(f0, LANE), _rup(h, LANE), _rup(c, LANE)
    n0p = _rup(n0, LANE)
    n2p = _rup(n2, BF16_SUBLANE)

    budget = _vmem_budget_bytes()

    # dst tile for the layer-0 aggregation: 128-multiples, shrunk to fit the
    # per-generation VMEM budget; n1 is padded to a multiple of tm.
    tm = (max(128, min(int(tm), 512)) // 128) * 128
    tm = min(tm, _rup(n1, LANE))
    while tm > 128 and _vmem_bytes(tm, n0p, _rup(n1, tm), n2p, f0p, hp, cp) > budget:
        tm -= 128
    n1p = _rup(n1, tm)

    bf, f32 = jnp.bfloat16, jnp.float32

    # lane-dense padded operands (bf16 for everything that feeds the MXU)
    x0_p = _pad2(feat0, n0p, f0p, bf)
    w0_p = _pad2(w0, f0p, hp, bf)
    b0_p = _pad2(b0, 1, hp, f32)
    hist0_p = _pad2(hist0, n0p, hp, bf)
    a0_p = _pad2(adj0, n1p, n0p, bf)
    aggh0_p = _pad2(aggh0, n1p, hp, bf)
    w1_p = _pad2(w1, hp, hp, bf)
    b1_p = _pad2(b1, 1, hp, f32)
    hist1_p = _pad_split_cols(hist1, n1p, hp, h, bf)       # merged concat halves
    a1_p = _pad2(adj1, n2p, n1p, bf)
    aggh1_p = _pad_split_cols(aggh1, n2p, hp, h, bf)       # merged concat halves
    w2_p = _pad_split_rows(w2, hp, h, cp, bf)              # merged concat halves
    b2_p = _pad2(b2, 1, cp, f32)

    tn0 = 256 if (n0p % 256 == 0) else 128

    def _run(single_buffer):
        def res_spec(shape):
            if single_buffer:
                # constant-index residents: one buffer, not two
                return pl.BlockSpec(shape, lambda i: (0, 0),
                                    pipeline_mode=pl.Buffered(1))
            return pl.BlockSpec(shape, lambda i: (0, 0))

        def row_tiled(rows, cols):
            return pl.BlockSpec((rows, cols), lambda i: (i, 0))

        # ---- phase 1 ------------------------------------------------------
        hm0_p = pl.pallas_call(
            _hm0_kernel,
            out_shape=jax.ShapeDtypeStruct((n0p, hp), bf),
            grid_spec=pltpu.PrefetchScalarGridSpec(
                num_scalar_prefetch=0,
                grid=(n0p // tn0,),
                in_specs=[row_tiled(tn0, f0p),      # X0
                          res_spec((f0p, hp)),       # W0
                          res_spec((1, hp)),         # b0
                          row_tiled(tn0, hp)],       # hist_0
                out_specs=row_tiled(tn0, hp),
            ),
            compiler_params=pltpu.CompilerParams(
                dimension_semantics=("parallel",),
                vmem_limit_bytes=budget),
        )(x0_p, w0_p, b0_p, hist0_p)

        # ---- phase 2 + 3 fused ---------------------------------------------
        out_padded = pl.pallas_call(
            functools.partial(_fused_kernel, tm=tm, hp=hp),
            out_shape=jax.ShapeDtypeStruct((n2p, cp), f32),
            grid_spec=pltpu.PrefetchScalarGridSpec(
                num_scalar_prefetch=0,
                grid=(n1p // tm,),
                in_specs=[
                    res_spec((n0p, hp)),                 # hm0 (resident)
                    row_tiled(tm, n0p),                  # A0_mean (dst-tiled)
                    row_tiled(tm, hp),                   # agg_h_0
                    row_tiled(tm, 2 * hp),               # hist_1 (merged halves)
                    res_spec((hp, hp)),                  # W1
                    res_spec((1, hp)),                   # b1
                    pl.BlockSpec(memory_space=pl.ANY),   # A1_mean (manual DMA)
                    pl.BlockSpec(memory_space=pl.ANY),   # agg_h_1 (manual DMA)
                    res_spec((2 * hp, cp)),              # W2 (merged halves)
                    res_spec((1, cp)),                   # b2
                ],
                out_specs=pl.BlockSpec((n2p, cp), lambda i: (0, 0)),
                scratch_shapes=[
                    pltpu.VMEM((n1p, 2 * hp), bf),       # hm1 (merged concat halves)
                    pltpu.VMEM((n2p, n1p), bf),          # A1 landing buffer
                    pltpu.VMEM((n2p, 2 * hp), bf),       # agg_h_1 landing buffer
                    pltpu.SemaphoreType.DMA((2,)),
                ],
            ),
            compiler_params=pltpu.CompilerParams(
                # scratch state is carried across grid steps -> sequential
                dimension_semantics=("arbitrary",),
                vmem_limit_bytes=budget),
        )(hm0_p, a0_p, aggh0_p, hist1_p, w1_p, b1_p, a1_p, aggh1_p, w2_p, b2_p)
        return out_padded

    try:
        out_padded = _run(True)
    except Exception:
        # robust fallback if single-buffer pipeline_mode is unsupported
        out_padded = _run(False)

    # TODO(synk): the NodeFlow history writeback (nf.layers[i].data['h_i'] =
    # new_history) only mutates cached NodeFlow state and never feeds the
    # returned activations, so it is not modelled.
    # TODO(synk): this implements the module's n_layers == 2 configuration;
    # n_layers > 2 would add intermediate relu NodeUpdate phases.
    # TODO(synk): realistic sparse NodeFlow blocks would replace the dense
    # mean-adjacency matmul with a scalar-prefetched neighbor gather.
    return out_padded[:n2, :c]


# ---------------------------------------------------------------------------
# pure-JAX f32 reference for correctness checking
# ---------------------------------------------------------------------------
def gcn_sampling_reference(params, nf):
    h = jnp.maximum(nf["feat0"] @ params["W0"] + params["b0"], 0.0)
    # layer 0 (NodeUpdate id=1, concat)
    hm = h - nf["hist"][0]
    agg = nf["adj"][0] @ hm
    y = (agg + nf["agg_hist"][0]) @ params["layers_W"][0] + params["layers_b"][0]
    h = jnp.concatenate([y, jnp.maximum(y, 0.0)], axis=1)
    # layer 1 (NodeUpdate id=2, no activation)
    hm = h - nf["hist"][1]
    agg = nf["adj"][1] @ hm
    return (agg + nf["agg_hist"][1]) @ params["layers_W"][1] + params["layers_b"][1]


def _mean_adj(key, n_dst, n_src):
    # random 0/1 adjacency, guaranteed >=1 neighbor per dst, row-normalized
    a = (jax.random.uniform(key, (n_dst, n_src)) < 0.3).astype(jnp.float32)
    a = a.at[:, 0].set(1.0)
    return a / jnp.sum(a, axis=1, keepdims=True)


if __name__ == "__main__":
    in_feats, n_hidden, n_classes, n_layers = 32, 16, 8, 2
    N0, N1, N2 = 64, 32, 16  # NodeFlow layer node counts

    key = jax.random.PRNGKey(0)
    ks = jax.random.split(key, 16)

    # parameters stored as [in, out] = W_pt.T
    params = {
        "W0": jax.random.normal(ks[0], (in_feats, n_hidden), jnp.float32) * 0.1,
        "b0": jax.random.normal(ks[1], (1, n_hidden), jnp.float32) * 0.1,
        "layers_W": [
            jax.random.normal(ks[2], (n_hidden, n_hidden), jnp.float32) * 0.1,
            jax.random.normal(ks[3], (2 * n_hidden, n_classes), jnp.float32) * 0.1,
        ],
        "layers_b": [
            jax.random.normal(ks[4], (1, n_hidden), jnp.float32) * 0.1,
            jax.random.normal(ks[5], (1, n_classes), jnp.float32) * 0.1,
        ],
    }

    # synthetic NodeFlow data
    nf = {
        "feat0": jax.random.normal(ks[6], (N0, in_feats), jnp.float32),
        "hist": [
            jax.random.normal(ks[7], (N0, n_hidden), jnp.float32) * 0.1,       # h_0
            jax.random.normal(ks[8], (N1, 2 * n_hidden), jnp.float32) * 0.1,   # h_1
        ],
        "agg_hist": [
            jax.random.normal(ks[9], (N1, n_hidden), jnp.float32) * 0.1,       # agg_h_0
            jax.random.normal(ks[10], (N2, 2 * n_hidden), jnp.float32) * 0.1,  # agg_h_1
        ],
        "adj": [
            _mean_adj(ks[11], N1, N0),
            _mean_adj(ks[12], N2, N1),
        ],
    }

    out = gcn_sampling_forward(params, nf)
    out = jax.block_until_ready(out)

    ref = gcn_sampling_reference(params, nf)
    assert out.shape == (N2, n_classes), out.shape
    # bf16 MXU inputs with f32 accumulation -> loose-but-safe tolerance vs f32 ref
    assert jnp.allclose(out, ref, atol=2e-2, rtol=2e-2), "mismatch vs reference"

    print("KERNEL_OK")
</pallas_src>

<mosaic_0001>
module attributes {stable_mosaic.version = 11 : i64} {
  func.func @_hm0_kernel(%arg0: i32, %arg1: memref<128x128xbf16, #tpu.memory_space<vmem>>, %arg2: memref<128x128xbf16, #tpu.memory_space<vmem>>, %arg3: memref<1x128xf32, #tpu.memory_space<vmem>>, %arg4: memref<128x128xbf16, #tpu.memory_space<vmem>>, %arg5: memref<128x128xbf16, #tpu.memory_space<vmem>>) attributes {dimension_semantics = [#tpu.dimension_semantics<parallel>], iteration_bounds = array<i64: 1>, scalar_prefetch = 0 : i64, scratch_operands = 0 : i64, tpu.core_type = #tpu.core_type<tc>, window_params = [{transform_indices = @transform_0, window_bounds = array<i64: 128, 128>}, {pipeline_mode = #tpu.pipeline_mode<synchronous>, transform_indices = @transform_1, window_bounds = array<i64: 128, 128>}, {pipeline_mode = #tpu.pipeline_mode<synchronous>, transform_indices = @transform_2, window_bounds = array<i64: 1, 128>}, {transform_indices = @transform_3, window_bounds = array<i64: 128, 128>}, {transform_indices = @transform_4, window_bounds = array<i64: 128, 128>}]} {
    %c0 = arith.constant 0 : index
    %c0_0 = arith.constant 0 : index
    %0 = vector.load %arg1[%c0, %c0_0] : memref<128x128xbf16, #tpu.memory_space<vmem>>, vector<128x128xbf16>
    %c0_1 = arith.constant 0 : index
    %c0_2 = arith.constant 0 : index
    %1 = vector.load %arg2[%c0_1, %c0_2] : memref<128x128xbf16, #tpu.memory_space<vmem>>, vector<128x128xbf16>
    %cst = arith.constant dense<0.000000e+00> : vector<128x128xf32>
    %2 = tpu.matmul %0, %1, %cst {dimension_numbers = #tpu.dot_dimension_numbers<[1], [0], [0], [1], [0, 0, 1, 1], [], []>} : vector<128x128xbf16>, vector<128x128xbf16>, vector<128x128xf32> -> vector<128x128xf32>
    %c0_3 = arith.constant 0 : index
    %c0_4 = arith.constant 0 : index
    %3 = vector.load %arg3[%c0_3, %c0_4] : memref<1x128xf32, #tpu.memory_space<vmem>>, vector<1x128xf32>
    %4 = vector.broadcast %3 : vector<1x128xf32> to vector<128x128xf32>
    %5 = arith.addf %2, %4 : vector<128x128xf32>
    %cst_5 = arith.constant 0.000000e+00 : f32
    %6 = vector.broadcast %cst_5 : f32 to vector<128x128xf32>
    %7 = arith.maximumf %5, %6 : vector<128x128xf32>
    %c0_6 = arith.constant 0 : index
    %c0_7 = arith.constant 0 : index
    %8 = vector.load %arg4[%c0_6, %c0_7] : memref<128x128xbf16, #tpu.memory_space<vmem>>, vector<128x128xbf16>
    %9 = arith.extf %8 : vector<128x128xbf16> to vector<128x128xf32>
    %10 = arith.subf %7, %9 : vector<128x128xf32>
    %11 = arith.truncf %10 : vector<128x128xf32> to vector<128x128xbf16>
    %c0_8 = arith.constant 0 : index
    %c0_9 = arith.constant 0 : index
    %12 = vector.load %arg5[%c0_8, %c0_9] : memref<128x128xbf16, #tpu.memory_space<vmem>>, vector<128x128xbf16>
    tpu.vector_store %arg5[%c0_8, %c0_9], %11 {strides = array<i32>} : memref<128x128xbf16, #tpu.memory_space<vmem>>, vector<128x128xbf16>,
    return
  }
  func.func @transform_0(%arg0: i32) -> (i32, i32) {
    %c0_i32 = arith.constant 0 : i32
    %c0_i32_0 = arith.constant 0 : i32
    return %arg0, %c0_i32 : i32, i32
  }
  func.func @transform_1(%arg0: i32) -> (i32, i32) {
    %c0_i32 = arith.constant 0 : i32
    %c0_i32_0 = arith.constant 0 : i32
    %c0_i32_1 = arith.constant 0 : i32
    return %c0_i32, %c0_i32_0 : i32, i32
  }
  func.func @transform_2(%arg0: i32) -> (i32, i32) {
    %c0_i32 = arith.constant 0 : i32
    %c0_i32_0 = arith.constant 0 : i32
    %c0_i32_1 = arith.constant 0 : i32
    return %c0_i32, %c0_i32_0 : i32, i32
  }
  func.func @transform_3(%arg0: i32) -> (i32, i32) {
    %c0_i32 = arith.constant 0 : i32
    %c0_i32_0 = arith.constant 0 : i32
    return %arg0, %c0_i32 : i32, i32
  }
  func.func @transform_4(%arg0: i32) -> (i32, i32) {
    %c0_i32 = arith.constant 0 : i32
    %c0_i32_0 = arith.constant 0 : i32
    return %arg0, %c0_i32 : i32, i32
  }
}

module attributes {stable_mosaic.version = 11 : i64} {
  func.func @_hm0_kernel(%arg0: i32, %arg1: memref<128x128xbf16, #tpu.memory_space<vmem>>, %arg2: memref<128x128xbf16, #tpu.memory_space<vmem>>, %arg3: memref<1x128xf32, #tpu.memory_space<vmem>>, %arg4: memref<128x128xbf16, #tpu.memory_space<vmem>>, %arg5: memref<128x128xbf16, #tpu.memory_space<vmem>>) attributes {dimension_semantics = [#tpu.dimension_semantics<parallel>], iteration_bounds = array<i64: 1>, scalar_prefetch = 0 : i64, scratch_operands = 0 : i64, tpu.core_type = #tpu.core_type<tc>, window_params = [{transform_indices = @transform_0, window_bounds = array<i64: 128, 128>}, {pipeline_mode = #tpu.pipeline_mode<synchronous>, transform_indices = @transform_1, window_bounds = array<i64: 128, 128>}, {pipeline_mode = #tpu.pipeline_mode<synchronous>, transform_indices = @transform_2, window_bounds = array<i64: 1, 128>}, {transform_indices = @transform_3, window_bounds = array<i64: 128, 128>}, {transform_indices = @transform_4, window_bounds = array<i64: 128, 128>}]} {
    %c0 = arith.constant 0 : index
    %c0_0 = arith.constant 0 : index
    %0 = vector.load %arg1[%c0, %c0_0] : memref<128x128xbf16, #tpu.memory_space<vmem>>, vector<128x128xbf16>
    %c0_1 = arith.constant 0 : index
    %c0_2 = arith.constant 0 : index
    %1 = vector.load %arg2[%c0_1, %c0_2] : memref<128x128xbf16, #tpu.memory_space<vmem>>, vector<128x128xbf16>
    %cst = arith.constant dense<0.000000e+00> : vector<128x128xf32>
    %2 = tpu.matmul %0, %1, %cst {dimension_numbers = #tpu.dot_dimension_numbers<[1], [0], [0], [1], [0, 0, 1, 1], [], []>} : vector<128x128xbf16>, vector<128x128xbf16>, vector<128x128xf32> -> vector<128x128xf32>
    %c0_3 = arith.constant 0 : index
    %c0_4 = arith.constant 0 : index
    %3 = vector.load %arg3[%c0_3, %c0_4] : memref<1x128xf32, #tpu.memory_space<vmem>>, vector<1x128xf32>
    %4 = vector.broadcast %3 : vector<1x128xf32> to vector<128x128xf32>
    %5 = arith.addf %2, %4 : vector<128x128xf32>
    %cst_5 = arith.constant 0.000000e+00 : f32
    %6 = vector.broadcast %cst_5 : f32 to vector<128x128xf32>
    %7 = arith.maximumf %5, %6 : vector<128x128xf32>
    %c0_6 = arith.constant 0 : index
    %c0_7 = arith.constant 0 : index
    %8 = vector.load %arg4[%c0_6, %c0_7] : memref<128x128xbf16, #tpu.memory_space<vmem>>, vector<128x128xbf16>
    %9 = arith.extf %8 : vector<128x128xbf16> to vector<128x128xf32>
    %10 = arith.subf %7, %9 : vector<128x128xf32>
    %11 = arith.truncf %10 : vector<128x128xf32> to vector<128x128xbf16>
    %c0_8 = arith.constant 0 : index
    %c0_9 = arith.constant 0 : index
    %12 = vector.load %arg5[%c0_8, %c0_9] : memref<128x128xbf16, #tpu.memory_space<vmem>>, vector<128x128xbf16>
    tpu.vector_store %arg5[%c0_8, %c0_9], %11 {strides = array<i32>} : memref<128x128xbf16, #tpu.memory_space<vmem>>, vector<128x128xbf16>,
    return
  }
  func.func @transform_0(%arg0: i32) -> (i32, i32) {
    %c0_i32 = arith.constant 0 : i32
    %c0_i32_0 = arith.constant 0 : i32
    return %arg0, %c0_i32 : i32, i32
  }
  func.func @transform_1(%arg0: i32) -> (i32, i32) {
    %c0_i32 = arith.constant 0 : i32
    %c0_i32_0 = arith.constant 0 : i32
    %c0_i32_1 = arith.constant 0 : i32
    return %c0_i32, %c0_i32_0 : i32, i32
  }
  func.func @transform_2(%arg0: i32) -> (i32, i32) {
    %c0_i32 = arith.constant 0 : i32
    %c0_i32_0 = arith.constant 0 : i32
    %c0_i32_1 = arith.constant 0 : i32
    return %c0_i32, %c0_i32_0 : i32, i32
  }
  func.func @transform_3(%arg0: i32) -> (i32, i32) {
    %c0_i32 = arith.constant 0 : i32
    %c0_i32_0 = arith.constant 0 : i32
    return %arg0, %c0_i32 : i32, i32
  }
  func.func @transform_4(%arg0: i32) -> (i32, i32) {
    %c0_i32 = arith.constant 0 : i32
    %c0_i32_0 = arith.constant 0 : i32
    return %arg0, %c0_i32 : i32, i32
  }
}

</mosaic_0001>

<bundles_post_ra>
// kernel: tpu_custom_call.1
= control target key start
LH: loop header
LB: loop body
LE: loop exit
PB: predicated region body
PF: predicated region fallthrough
CT: control target
= control target key end

     0   :  { %9 = vsyncpa [#allocation3], 0  ;;  %s912_s0 = inlined_call_operand.hbm [shape: bf16[128,128], index: 0, kind: input, shape index: {}]   ;;  %s913_s1 = inlined_call_operand.hbm [shape: bf16[128,128], index: 1, kind: input, shape index: {}]   ;;  %s914_s2 = inlined_call_operand.vmem [shape: f32[1,128], index: 2, kind: input, shape index: {}]   ;;  %s915_s3 = inlined_call_operand.hbm [shape: bf16[128,128], index: 3, kind: input, shape index: {}]   ;;  %s916_s4 = inlined_call_operand.hbm [shape: bf16[128,128], index: 4, kind: output, shape index: {}]  }
   0x1   :  { %10 = vsyncpa [#allocation6], 0 }
   0x2   :  { %11 = vsyncpa [#allocation4], 0  ;;  %s769_s15 = smov [#allocation5]   ;;  %s770_s17 = smov [#allocation2]  }
   0x3   :  { %s29_s16 = sshll.u32 %s769_s15, 4  ;;  %s17_s18 = sshll.u32 %s770_s17, 4  ;;  %s30_s16 = int_to_ptr.vmem [resolvable:$true] %s29_s16  ;;  %s800_s18 = int_to_ptr.vmem [resolvable:$true] %s17_s18 }
   0x4   :  { %s675_s21 = scalar_lea.hbm %s913_s1, 1024 }
   0x5   :  { %p676_p0 = scmp.ne.s32.totalorder %s913_s1, %s675_s21  ;;  %p679_p1 = scmp.lt.u32.totalorder %s675_s21, %s913_s1 }
   0x7   :  { %p681_p2 = pnand %p679_p1, %p676_p0 }
   0x9   :  { %684 = shalt.err (!%p681_p2)
}
   0xa   :  { %s685_s26 = scalar_lea.vmem %s30_s16, 1024  ;;  %p690_p4 = scmp.lt.s32.totalorder %s30_s16, %s30_s16 }
   0xb   :  { %p686_p3 = scmp.ne.s32.totalorder %s30_s16, %s685_s26  ;;  %p691_p5 = scmp.lt.s32.totalorder %s685_s26, %s685_s26 }
   0xd   :  { %p692_p6 = por %p691_p5, %p690_p4 }
   0xf   :  { %p693_p7 = pnand %p692_p6, %p686_p3 }
  0x11   :  { %696 = shalt.err (!%p693_p7)
}
  0x12   :  { %s771_s27 = smov 64   ;;  %s772_s28 = smov 4  }
  0x13   :  { %35 = dma.hbm_to_vmem [thread:$0]  %s913_s1, 1024, %s30_s16, [#allocation6], %s771_s27, %s771_s27, %s772_s28  }
  0x14   :  { %s697_s7 = scalar_lea.hbm %s912_s0, 1024 }
  0x15   :  { %p698_p8 = scmp.ne.s32.totalorder %s912_s0, %s697_s7  ;;  %p701_p9 = scmp.lt.u32.totalorder %s697_s7, %s912_s0 }
  0x17   :  { %p703_p10 = pnand %p701_p9, %p698_p8 }
  0x19   :  { %706 = shalt.err (!%p703_p10)
}
  0x1a   :  { %s707_s12 = scalar_lea.vmem %s800_s18, 1024  ;;  %p712_p12 = scmp.lt.s32.totalorder %s800_s18, %s800_s18 }
  0x1b   :  { %p708_p11 = scmp.ne.s32.totalorder %s800_s18, %s707_s12  ;;  %p713_p13 = scmp.lt.s32.totalorder %s707_s12, %s707_s12 }
  0x1d   :  { %p714_p0 = por %p713_p13, %p712_p12 }
  0x1f   :  { %p715_p1 = pnand %p714_p0, %p708_p11 }
  0x21   :  { %718 = shalt.err (!%p715_p1)
}
  0x22   :  { %23 = dma.hbm_to_vmem [thread:$0]  %s912_s0, 1024, %s800_s18, [#allocation3], %s771_s27, %s771_s27, %s772_s28  }
  0x23   :  { %s773_s14 = smov [#allocation7]   ;;  %s719_s19 = scalar_lea.hbm %s915_s3, 1024 }
  0x24   :  { %s43_s15 = sshll.u32 %s773_s14, 4  ;;  %p720_p2 = scmp.ne.s32.totalorder %s915_s3, %s719_s19  ;;  %s44_s15 = int_to_ptr.vmem [resolvable:$true] %s43_s15 }
  0x25   :  { %p723_p3 = scmp.lt.u32.totalorder %s719_s19, %s915_s3 }
  0x27   :  { %p725_p4 = pnand %p723_p3, %p720_p2 }
  0x29   :  { %728 = shalt.err (!%p725_p4)
}
  0x2a   :  { %s729_s24 = scalar_lea.vmem %s44_s15, 1024  ;;  %p734_p6 = scmp.lt.s32.totalorder %s44_s15, %s44_s15 }
  0x2b   :  { %p730_p5 = scmp.ne.s32.totalorder %s44_s15, %s729_s24  ;;  %p735_p7 = scmp.lt.s32.totalorder %s729_s24, %s729_s24 }
  0x2d   :  { %p736_p8 = por %p735_p7, %p734_p6 }
  0x2f   :  { %p737_p9 = pnand %p736_p8, %p730_p5 }
  0x31   :  { %740 = shalt.err (!%p737_p9)
}
  0x32   :  { %49 = dma.hbm_to_vmem [thread:$0]  %s915_s3, 1024, %s44_s15, [#allocation6], %s771_s27, %s771_s27, %s772_s28  }
  0x33   :  { %763 = dma.done.wait [#allocation3], 1024  }
  0x34   :  { %764 = vsyncadd [#allocation3], 4294966272 }
  0x35   :  { %765 = dma.done.wait [#allocation6], 2048  }
  0x36   :  { %766 = vsyncadd [#allocation6], 4294965248  ;;  %v659_v0 = vld [vmem:[#allocation5] sm:$0xff]   ;;  %v660_v1 = vld [vmem:[#allocation5 + $0x8] sm:$0xff]  }
  0x37   :  { %605 = vmatprep.subr.bf16.mxu0 %v659_v0  ;;  %637 = vmatprep.subr.bf16.mxu1 %v659_v0  ;;  %v661_v2 = vld [vmem:[#allocation5 + $0x10] sm:$0xff]   ;;  %v662_v3 = vld [vmem:[#allocation5 + $0x18] sm:$0xff]   ;;  %v667_v4 = vld [vmem:[#allocation2] sm:$0xff]  }
  0x38   :  { %606 = vmatpush3.bf16.msra.mxu0 %v659_v0  ;;  %645 = vmatpush3.bf16.msra.mxu1 %v659_v0  ;;  %v668_v5 = vld [vmem:[#allocation2 + $0x20] sm:$0xff]   ;;  %v664_v7 = vld [vmem:[#allocation5 + $0x28] sm:$0xff]   ;;  %v665_v8 = vld [vmem:[#allocation5 + $0x30] sm:$0xff]  }
  0x39   :  { %607 = vmatprep.subr.bf16.mxu0 %v660_v1  ;;  %638 = vmatprep.subr.bf16.mxu1 %v660_v1  ;;  %v663_v6 = vld [vmem:[#allocation5 + $0x20] sm:$0xff]   ;;  %v666_v9 = vld [vmem:[#allocation5 + $0x38] sm:$0xff]   ;;  %v669_v10 = vld [vmem:[#allocation2 + $0x8] sm:$0xff]  }
  0x3a   :  { %621 = vmatprep.mubr.bf16.mxu0 %v667_v4  ;;  %629 = vmatprep.mubr.bf16.mxu1 %v668_v5  ;;  %v670_v11 = vld [vmem:[#allocation2 + $0x28] sm:$0xff]   ;;  %v671_v12 = vld [vmem:[#allocation2 + $0x10] sm:$0xff]   ;;  %v673_v14 = vld [vmem:[#allocation2 + $0x18] sm:$0xff]  }
  0x3b   :  { %v672_v13 = vld [vmem:[#allocation2 + $0x30] sm:$0xff]   ;;  %v674_v15 = vld [vmem:[#allocation2 + $0x38] sm:$0xff]   ;;  %v575_v16 = vld [vmem:[#allocation7 + $0x8] sm:$0xff]  }
  0x3c   :  { %608 = vmatpush3.bf16.msra.mxu0 %v660_v1  ;;  %646 = vmatpush3.bf16.msra.mxu1 %v660_v1  ;;  %v579_v17 = vld [vmem:[#allocation7 + $0x28] sm:$0xff]   ;;  %v504_v18 = vld [vmem:[#allocation7] sm:$0xff]   ;;  %v857_v21 = vld [vmem:[#allocation7 + $0x18] sm:$0xff]   ;;  %v509_v23 = vunpack.c.l.bf16 %v575_v16  ;;  %v510_v31 = vunpack.c.h.bf16 %v575_v16 }
  0x3d   :  { %609 = vmatprep.subr.bf16.mxu0 %v661_v2  ;;  %639 = vmatprep.subr.bf16.mxu1 %v661_v2  ;;  %v578_v19 = vld [vmem:[#allocation7 + $0x20] sm:$0xff]   ;;  %v859_v22 = vld [vmem:[#allocation7 + $0x38] sm:$0xff]   ;;  %v525_v24 = vunpack.c.l.bf16 %v579_v17  ;;  %v505_v25 = vunpack.c.l.bf16 %v504_v18  ;;  %v861_v27 = vld [vmem:[#allocation7 + $0x10] sm:$0xff]   ;;  %v526_v32 = vunpack.c.h.bf16 %v579_v17  ;;  %v506_v33 = vunpack.c.h.bf16 %v504_v18 }
  0x3e   :  { %v855_v20 = vld [vmem:[%s914_s2] ss:$0 sm:$0xff]  ;;  %v521_v26 = vunpack.c.l.bf16 %v578_v19  ;;  %v863_v28 = vld [vmem:[#allocation7 + $0x30] sm:$0xff]   ;;  %v522_v34 = vunpack.c.h.bf16 %v578_v19  ;;  %v517_v39 = vunpack.c.l.bf16 %v857_v21  ;;  %v533_v40 = vunpack.c.l.bf16 %v859_v22  ;;  %s774_s2 = smov [#allocation8]  }
  0x3f   :  { %v513_v45 = vunpack.c.l.bf16 %v861_v27  ;;  %v529_v46 = vunpack.c.l.bf16 %v863_v28  ;;  %v518_v59 = vunpack.c.h.bf16 %v857_v21  ;;  %v534_v60 = vunpack.c.h.bf16 %v859_v22  ;;  %s441_s26 = sshll.u32 %s774_s2, 4  ;;  %s442_s26 = int_to_ptr.vmem [resolvable:$true] %s441_s26 }
  0x40   :  { %610 = vmatpush3.bf16.msra.mxu0 %v661_v2  ;;  %647 = vmatpush3.bf16.msra.mxu1 %v661_v2  ;;  %v514_v63 = vunpack.c.h.bf16 %v861_v27  ;;  %v530_v0 = vunpack.c.h.bf16 %v863_v28  ;;  %s741_s29 = scalar_lea.vmem %s442_s26, 1024  ;;  %p746_p11 = scmp.lt.s32.totalorder %s442_s26, %s442_s26 }
  0x41   :  { %611 = vmatprep.subr.bf16.mxu0 %v662_v3  ;;  %640 = vmatprep.subr.bf16.mxu1 %v662_v3  ;;  %p742_p10 = scmp.ne.s32.totalorder %s442_s26, %s741_s29  ;;  %p747_p12 = scmp.lt.s32.totalorder %s741_s29, %s741_s29 }
  0x43   :  { %p748_p13 = por %p747_p12, %p746_p11 }
  0x44   :  { %612 = vmatpush3.bf16.msra.mxu0 %v662_v3  ;;  %648 = vmatpush3.bf16.msra.mxu1 %v662_v3 }
  0x45   :  { %613 = vmatprep.subr.bf16.mxu0 %v663_v6  ;;  %641 = vmatprep.subr.bf16.mxu1 %v663_v6  ;;  %p749_p0 = pnand %p748_p13, %p742_p10 }
  0x48   :  { %614 = vmatpush3.bf16.msra.mxu0 %v663_v6  ;;  %649 = vmatpush3.bf16.msra.mxu1 %v663_v6 }
  0x49   :  { %615 = vmatprep.subr.bf16.mxu0 %v664_v7  ;;  %642 = vmatprep.subr.bf16.mxu1 %v664_v7 }
  0x4c   :  { %616 = vmatpush3.bf16.msra.mxu0 %v664_v7  ;;  %650 = vmatpush3.bf16.msra.mxu1 %v664_v7 }
  0x4d   :  { %617 = vmatprep.subr.bf16.mxu0 %v665_v8  ;;  %643 = vmatprep.subr.bf16.mxu1 %v665_v8 }
  0x50   :  { %618 = vmatpush3.bf16.msra.mxu0 %v665_v8  ;;  %651 = vmatpush3.bf16.msra.mxu1 %v665_v8 }
  0x51   :  { %619 = vmatprep.subr.bf16.mxu0 %v666_v9  ;;  %644 = vmatprep.subr.bf16.mxu1 %v666_v9 }
  0x54   :  { %620 = vmatpush3.bf16.msra.mxu0 %v666_v9  ;;  %652 = vmatpush3.bf16.msra.mxu1 %v666_v9 }
  0x57   :  { %622 = vmatmul.mubr.bf16.vlgmr.msra.gmra.mrb[0].mxu0 %v669_v10  ;;  %630 = vmatmul.mubr.bf16.vlgmr.msra.gmra.mrb[0].mxu1 %v670_v11 }
  0x58   :  { %625 = vmatprep.mubr.bf16.mxu0 %v671_v12  ;;  %633 = vmatprep.mubr.bf16.mxu1 %v672_v13 }
  0x5f   :  { %626 = vmatmul.mubr.bf16.gmra.mrb[4].mxu0 %v673_v14  ;;  %634 = vmatmul.mubr.bf16.gmra.mrb[4].mxu1 %v674_v15 }
 0x12a   :  { %v623_v29 = vpop.f32.mrb[0].mxu0  ;;  %v631_v30 = vpop.f32.mrb[0].mxu1 }
 0x12b   :  { %v238_v35 = vadd.f32 %v623_v29, %v855_v20  ;;  %v270_v36 = vadd.f32 %v631_v30, %v855_v20  ;;  %v229_v37 = vpop.f32.mrb[1].mxu0  ;;  %v261_v38 = vpop.f32.mrb[1].mxu1 }
 0x12c   :  { %v230_v41 = vadd.f32 %v855_v20, %v229_v37  ;;  %v262_v42 = vadd.f32 %v855_v20, %v261_v38  ;;  %v624_v43 = vpop.f32.mrb[2].mxu0  ;;  %v632_v44 = vpop.f32.mrb[2].mxu1 }
 0x12d   :  { %v294_v47 = vmax.f32 %v238_v35, 0.0  ;;  %v302_v48 = vmax.f32 %v270_v36, 0.0  ;;  %v241_v49 = vadd.f32 %v624_v43, %v855_v20  ;;  %v273_v50 = vadd.f32 %v632_v44, %v855_v20  ;;  %v232_v51 = vpop.f32.mrb[3].mxu0  ;;  %v264_v52 = vpop.f32.mrb[3].mxu1 }
 0x12e   :  { %v292_v53 = vmax.f32 %v230_v41, 0.0  ;;  %v300_v54 = vmax.f32 %v262_v42, 0.0  ;;  %v233_v55 = vadd.f32 %v855_v20, %v232_v51  ;;  %v265_v56 = vadd.f32 %v855_v20, %v264_v52 }
 0x12f   :  { %v295_v57 = vmax.f32 %v241_v49, 0.0  ;;  %v303_v58 = vmax.f32 %v273_v50, 0.0  ;;  %v342_v1 = vsub.f32 %v294_v47, %v509_v23  ;;  %v350_v2 = vsub.f32 %v302_v48, %v525_v24 }
 0x130   :  { %v293_v61 = vmax.f32 %v233_v55, 0.0  ;;  %v301_v62 = vmax.f32 %v265_v56, 0.0  ;;  %v340_v5 = vsub.f32 %v292_v53, %v505_v25  ;;  %v348_v6 = vsub.f32 %v300_v54, %v521_v26 }
 0x131   :  { %v343_v3 = vsub.f32 %v295_v57, %v510_v31  ;;  %v351_v4 = vsub.f32 %v303_v58, %v526_v32 }
 0x132   :  { %v341_v7 = vsub.f32 %v293_v61, %v506_v33  ;;  %v349_v8 = vsub.f32 %v301_v62, %v522_v34  ;;  %v627_v9 = vpop.f32.mrb[4].mxu0  ;;  %v635_v10 = vpop.f32.mrb[4].mxu1 }
 0x133   :  { %v543_v11 = vpack.c.bf16 %v343_v3, %v342_v1  ;;  %v563_v12 = vpack.c.bf16 %v351_v4, %v350_v2  ;;  %v254_v13 = vadd.f32 %v627_v9, %v855_v20  ;;  %v286_v14 = vadd.f32 %v635_v10, %v855_v20  ;;  %v245_v15 = vpop.f32.mrb[5].mxu0  ;;  %v277_v16 = vpop.f32.mrb[5].mxu1 }
 0x134   :  { %v538_v17 = vpack.c.bf16 %v341_v7, %v340_v5  ;;  %v558_v18 = vpack.c.bf16 %v349_v8, %v348_v6  ;;  %v246_v19 = vadd.f32 %v855_v20, %v245_v15  ;;  %v278_v23 = vadd.f32 %v855_v20, %v277_v16  ;;  %v628_v24 = vpop.f32.mrb[6].mxu0  ;;  %v636_v25 = vpop.f32.mrb[6].mxu1 }
 0x135   :  { %582 = vst [vmem:[#allocation8 + $0x8] sm:$0xff] %v543_v11   ;;  %586 = vst [vmem:[#allocation8 + $0x28] sm:$0xff] %v563_v12   ;;  %v298_v26 = vmax.f32 %v254_v13, 0.0  ;;  %v306_v29 = vmax.f32 %v286_v14, 0.0  ;;  %v257_v30 = vadd.f32 %v628_v24, %v855_v20  ;;  %v289_v31 = vadd.f32 %v636_v25, %v855_v20  ;;  %v248_v32 = vpop.f32.mrb[7].mxu0  ;;  %v280_v33 = vpop.f32.mrb[7].mxu1 }
 0x136   :  { %539 = vst [vmem:[#allocation8] sm:$0xff] %v538_v17   ;;  %585 = vst [vmem:[#allocation8 + $0x20] sm:$0xff] %v558_v18   ;;  %v296_v34 = vmax.f32 %v246_v19, 0.0  ;;  %v304_v35 = vmax.f32 %v278_v23, 0.0  ;;  %v249_v36 = vadd.f32 %v855_v20, %v248_v32  ;;  %v281_v37 = vadd.f32 %v855_v20, %v280_v33 }
 0x137   :  { %v299_v38 = vmax.f32 %v257_v30, 0.0  ;;  %v307_v41 = vmax.f32 %v289_v31, 0.0  ;;  %v346_v44 = vsub.f32 %v298_v26, %v517_v39  ;;  %v354_v47 = vsub.f32 %v306_v29, %v533_v40 }
 0x138   :  { %v297_v42 = vmax.f32 %v249_v36, 0.0  ;;  %v305_v43 = vmax.f32 %v281_v37, 0.0  ;;  %v344_v50 = vsub.f32 %v296_v34, %v513_v45  ;;  %v352_v20 = vsub.f32 %v304_v35, %v529_v46 }
 0x139   :  { %v347_v48 = vsub.f32 %v299_v38, %v518_v59  ;;  %v355_v49 = vsub.f32 %v307_v41, %v534_v60 }
 0x13a   :  { %v345_v51 = vsub.f32 %v297_v42, %v514_v63  ;;  %v353_v52 = vsub.f32 %v305_v43, %v530_v0 }
 0x13b   :  { %v553_v53 = vpack.c.bf16 %v347_v48, %v346_v44  ;;  %v573_v54 = vpack.c.bf16 %v355_v49, %v354_v47 }
 0x13c   :  { %v548_v55 = vpack.c.bf16 %v345_v51, %v344_v50  ;;  %v568_v21 = vpack.c.bf16 %v353_v52, %v352_v20 }
 0x13d   :  { %584 = vst [vmem:[#allocation8 + $0x18] sm:$0xff] %v553_v53   ;;  %588 = vst [vmem:[#allocation8 + $0x38] sm:$0xff] %v573_v54  }
 0x13e   :  { %583 = vst [vmem:[#allocation8 + $0x10] sm:$0xff] %v548_v55   ;;  %587 = vst [vmem:[#allocation8 + $0x30] sm:$0xff] %v568_v21  }
 0x13f   :  { %752 = shalt.err (!%p749_p0)
}
 0x140   :  { %s753_s6 = scalar_lea.hbm %s916_s4, 1024 }
 0x141   :  { %p754_p1 = scmp.ne.s32.totalorder %s916_s4, %s753_s6  ;;  %p757_p2 = scmp.lt.u32.totalorder %s753_s6, %s916_s4 }
 0x143   :  { %p759_p3 = pnand %p757_p2, %p754_p1 }
 0x145   :  { %762 = shalt.err (!%p759_p3)
}
 0x146   :  { %447 = dma.vmem_to_hbm [thread:$0]  %s442_s26, 1024, %s916_s4, [#allocation4], %s771_s27, %s771_s27, %s772_s28  }
 0x147   :  { %767 = dma.done.wait [#allocation4], 1024  }
 0x148   :  { %768 = vsyncadd [#allocation4], 4294966272 }
 0x149   :  { %451 = vsyncpa [#allocation3], 1 }
 0x14a   :  { %452 = vsyncpa [#allocation6], 1 }
 0x14b   :  { %453 = vsyncpa [#allocation4], 1 }

// kernel: tpu_custom_call.1
= control target key start
LH: loop header
LB: loop body
LE: loop exit
PB: predicated region body
PF: predicated region fallthrough
CT: control target
= control target key end

     0   :  { %9 = vsyncpa [#allocation3], 0  ;;  %s912_s0 = inlined_call_operand.hbm [shape: bf16[128,128], index: 0, kind: input, shape index: {}]   ;;  %s913_s1 = inlined_call_operand.hbm [shape: bf16[128,128], index: 1, kind: input, shape index: {}]   ;;  %s914_s2 = inlined_call_operand.vmem [shape: f32[1,128], index: 2, kind: input, shape index: {}]   ;;  %s915_s3 = inlined_call_operand.hbm [shape: bf16[128,128], index: 3, kind: input, shape index: {}]   ;;  %s916_s4 = inlined_call_operand.hbm [shape: bf16[128,128], index: 4, kind: output, shape index: {}]  }
   0x1   :  { %10 = vsyncpa [#allocation6], 0 }
   0x2   :  { %11 = vsyncpa [#allocation4], 0  ;;  %s769_s15 = smov [#allocation5]   ;;  %s770_s17 = smov [#allocation2]  }
   0x3   :  { %s29_s16 = sshll.u32 %s769_s15, 4  ;;  %s17_s18 = sshll.u32 %s770_s17, 4  ;;  %s30_s16 = int_to_ptr.vmem [resolvable:$true] %s29_s16  ;;  %s800_s18 = int_to_ptr.vmem [resolvable:$true] %s17_s18 }
   0x4   :  { %s675_s21 = scalar_lea.hbm %s913_s1, 1024 }
   0x5   :  { %p676_p0 = scmp.ne.s32.totalorder %s913_s1, %s675_s21  ;;  %p679_p1 = scmp.lt.u32.totalorder %s675_s21, %s913_s1 }
   0x7   :  { %p681_p2 = pnand %p679_p1, %p676_p0 }
   0x9   :  { %684 = shalt.err (!%p681_p2)
}
   0xa   :  { %s685_s26 = scalar_lea.vmem %s30_s16, 1024  ;;  %p690_p4 = scmp.lt.s32.totalorder %s30_s16, %s30_s16 }
   0xb   :  { %p686_p3 = scmp.ne.s32.totalorder %s30_s16, %s685_s26  ;;  %p691_p5 = scmp.lt.s32.totalorder %s685_s26, %s685_s26 }
   0xd   :  { %p692_p6 = por %p691_p5, %p690_p4 }
   0xf   :  { %p693_p7 = pnand %p692_p6, %p686_p3 }
  0x11   :  { %696 = shalt.err (!%p693_p7)
}
  0x12   :  { %s771_s27 = smov 64   ;;  %s772_s28 = smov 4  }
  0x13   :  { %35 = dma.hbm_to_vmem [thread:$0]  %s913_s1, 1024, %s30_s16, [#allocation6], %s771_s27, %s771_s27, %s772_s28  }
  0x14   :  { %s697_s7 = scalar_lea.hbm %s912_s0, 1024 }
  0x15   :  { %p698_p8 = scmp.ne.s32.totalorder %s912_s0, %s697_s7  ;;  %p701_p9 = scmp.lt.u32.totalorder %s697_s7, %s912_s0 }
  0x17   :  { %p703_p10 = pnand %p701_p9, %p698_p8 }
  0x19   :  { %706 = shalt.err (!%p703_p10)
}
  0x1a   :  { %s707_s12 = scalar_lea.vmem %s800_s18, 1024  ;;  %p712_p12 = scmp.lt.s32.totalorder %s800_s18, %s800_s18 }
  0x1b   :  { %p708_p11 = scmp.ne.s32.totalorder %s800_s18, %s707_s12  ;;  %p713_p13 = scmp.lt.s32.totalorder %s707_s12, %s707_s12 }
  0x1d   :  { %p714_p0 = por %p713_p13, %p712_p12 }
  0x1f   :  { %p715_p1 = pnand %p714_p0, %p708_p11 }
  0x21   :  { %718 = shalt.err (!%p715_p1)
}
  0x22   :  { %23 = dma.hbm_to_vmem [thread:$0]  %s912_s0, 1024, %s800_s18, [#allocation3], %s771_s27, %s771_s27, %s772_s28  }
  0x23   :  { %s773_s14 = smov [#allocation7]   ;;  %s719_s19 = scalar_lea.hbm %s915_s3, 1024 }
  0x24   :  { %s43_s15 = sshll.u32 %s773_s14, 4  ;;  %p720_p2 = scmp.ne.s32.totalorder %s915_s3, %s719_s19  ;;  %s44_s15 = int_to_ptr.vmem [resolvable:$true] %s43_s15 }
  0x25   :  { %p723_p3 = scmp.lt.u32.totalorder %s719_s19, %s915_s3 }
  0x27   :  { %p725_p4 = pnand %p723_p3, %p720_p2 }
  0x29   :  { %728 = shalt.err (!%p725_p4)
}
  0x2a   :  { %s729_s24 = scalar_lea.vmem %s44_s15, 1024  ;;  %p734_p6 = scmp.lt.s32.totalorder %s44_s15, %s44_s15 }
  0x2b   :  { %p730_p5 = scmp.ne.s32.totalorder %s44_s15, %s729_s24  ;;  %p735_p7 = scmp.lt.s32.totalorder %s729_s24, %s729_s24 }
  0x2d   :  { %p736_p8 = por %p735_p7, %p734_p6 }
  0x2f   :  { %p737_p9 = pnand %p736_p8, %p730_p5 }
  0x31   :  { %740 = shalt.err (!%p737_p9)
}
  0x32   :  { %49 = dma.hbm_to_vmem [thread:$0]  %s915_s3, 1024, %s44_s15, [#allocation6], %s771_s27, %s771_s27, %s772_s28  }
  0x33   :  { %763 = dma.done.wait [#allocation3], 1024  }
  0x34   :  { %764 = vsyncadd [#allocation3], 4294966272 }
  0x35   :  { %765 = dma.done.wait [#allocation6], 2048  }
  0x36   :  { %766 = vsyncadd [#allocation6], 4294965248  ;;  %v659_v0 = vld [vmem:[#allocation5] sm:$0xff]   ;;  %v660_v1 = vld [vmem:[#allocation5 + $0x8] sm:$0xff]  }
  0x37   :  { %605 = vmatprep.subr.bf16.mxu0 %v659_v0  ;;  %637 = vmatprep.subr.bf16.mxu1 %v659_v0  ;;  %v661_v2 = vld [vmem:[#allocation5 + $0x10] sm:$0xff]   ;;  %v662_v3 = vld [vmem:[#allocation5 + $0x18] sm:$0xff]   ;;  %v667_v4 = vld [vmem:[#allocation2] sm:$0xff]  }
  0x38   :  { %606 = vmatpush3.bf16.msra.mxu0 %v659_v0  ;;  %645 = vmatpush3.bf16.msra.mxu1 %v659_v0  ;;  %v668_v5 = vld [vmem:[#allocation2 + $0x20] sm:$0xff]   ;;  %v664_v7 = vld [vmem:[#allocation5 + $0x28] sm:$0xff]   ;;  %v665_v8 = vld [vmem:[#allocation5 + $0x30] sm:$0xff]  }
  0x39   :  { %607 = vmatprep.subr.bf16.mxu0 %v660_v1  ;;  %638 = vmatprep.subr.bf16.mxu1 %v660_v1  ;;  %v663_v6 = vld [vmem:[#allocation5 + $0x20] sm:$0xff]   ;;  %v666_v9 = vld [vmem:[#allocation5 + $0x38] sm:$0xff]   ;;  %v669_v10 = vld [vmem:[#allocation2 + $0x8] sm:$0xff]  }
  0x3a   :  { %621 = vmatprep.mubr.bf16.mxu0 %v667_v4  ;;  %629 = vmatprep.mubr.bf16.mxu1 %v668_v5  ;;  %v670_v11 = vld [vmem:[#allocation2 + $0x28] sm:$0xff]   ;;  %v671_v12 = vld [vmem:[#allocation2 + $0x10] sm:$0xff]   ;;  %v673_v14 = vld [vmem:[#allocation2 + $0x18] sm:$0xff]  }
  0x3b   :  { %v672_v13 = vld [vmem:[#allocation2 + $0x30] sm:$0xff]   ;;  %v674_v15 = vld [vmem:[#allocation2 + $0x38] sm:$0xff]   ;;  %v575_v16 = vld [vmem:[#allocation7 + $0x8] sm:$0xff]  }
  0x3c   :  { %608 = vmatpush3.bf16.msra.mxu0 %v660_v1  ;;  %646 = vmatpush3.bf16.msra.mxu1 %v660_v1  ;;  %v579_v17 = vld [vmem:[#allocation7 + $0x28] sm:$0xff]   ;;  %v504_v18 = vld [vmem:[#allocation7] sm:$0xff]   ;;  %v857_v21 = vld [vmem:[#allocation7 + $0x18] sm:$0xff]   ;;  %v509_v23 = vunpack.c.l.bf16 %v575_v16  ;;  %v510_v31 = vunpack.c.h.bf16 %v575_v16 }
  0x3d   :  { %609 = vmatprep.subr.bf16.mxu0 %v661_v2  ;;  %639 = vmatprep.subr.bf16.mxu1 %v661_v2  ;;  %v578_v19 = vld [vmem:[#allocation7 + $0x20] sm:$0xff]   ;;  %v859_v22 = vld [vmem:[#allocation7 + $0x38] sm:$0xff]   ;;  %v525_v24 = vunpack.c.l.bf16 %v579_v17  ;;  %v505_v25 = vunpack.c.l.bf16 %v504_v18  ;;  %v861_v27 = vld [vmem:[#allocation7 + $0x10] sm:$0xff]   ;;  %v526_v32 = vunpack.c.h.bf16 %v579_v17  ;;  %v506_v33 = vunpack.c.h.bf16 %v504_v18 }
  0x3e   :  { %v855_v20 = vld [vmem:[%s914_s2] ss:$0 sm:$0xff]  ;;  %v521_v26 = vunpack.c.l.bf16 %v578_v19  ;;  %v863_v28 = vld [vmem:[#allocation7 + $0x30] sm:$0xff]   ;;  %v522_v34 = vunpack.c.h.bf16 %v578_v19  ;;  %v517_v39 = vunpack.c.l.bf16 %v857_v21  ;;  %v533_v40 = vunpack.c.l.bf16 %v859_v22  ;;  %s774_s2 = smov [#allocation8]  }
  0x3f   :  { %v513_v45 = vunpack.c.l.bf16 %v861_v27  ;;  %v529_v46 = vunpack.c.l.bf16 %v863_v28  ;;  %v518_v59 = vunpack.c.h.bf16 %v857_v21  ;;  %v534_v60 = vunpack.c.h.bf16 %v859_v22  ;;  %s441_s26 = sshll.u32 %s774_s2, 4  ;;  %s442_s26 = int_to_ptr.vmem [resolvable:$true] %s441_s26 }
  0x40   :  { %610 = vmatpush3.bf16.msra.mxu0 %v661_v2  ;;  %647 = vmatpush3.bf16.msra.mxu1 %v661_v2  ;;  %v514_v63 = vunpack.c.h.bf16 %v861_v27  ;;  %v530_v0 = vunpack.c.h.bf16 %v863_v28  ;;  %s741_s29 = scalar_lea.vmem %s442_s26, 1024  ;;  %p746_p11 = scmp.lt.s32.totalorder %s442_s26, %s442_s26 }
  0x41   :  { %611 = vmatprep.subr.bf16.mxu0 %v662_v3  ;;  %640 = vmatprep.subr.bf16.mxu1 %v662_v3  ;;  %p742_p10 = scmp.ne.s32.totalorder %s442_s26, %s741_s29  ;;  %p747_p12 = scmp.lt.s32.totalorder %s741_s29, %s741_s29 }
  0x43   :  { %p748_p13 = por %p747_p12, %p746_p11 }
  0x44   :  { %612 = vmatpush3.bf16.msra.mxu0 %v662_v3  ;;  %648 = vmatpush3.bf16.msra.mxu1 %v662_v3 }
  0x45   :  { %613 = vmatprep.subr.bf16.mxu0 %v663_v6  ;;  %641 = vmatprep.subr.bf16.mxu1 %v663_v6  ;;  %p749_p0 = pnand %p748_p13, %p742_p10 }
  0x48   :  { %614 = vmatpush3.bf16.msra.mxu0 %v663_v6  ;;  %649 = vmatpush3.bf16.msra.mxu1 %v663_v6 }
  0x49   :  { %615 = vmatprep.subr.bf16.mxu0 %v664_v7  ;;  %642 = vmatprep.subr.bf16.mxu1 %v664_v7 }
  0x4c   :  { %616 = vmatpush3.bf16.msra.mxu0 %v664_v7  ;;  %650 = vmatpush3.bf16.msra.mxu1 %v664_v7 }
  0x4d   :  { %617 = vmatprep.subr.bf16.mxu0 %v665_v8  ;;  %643 = vmatprep.subr.bf16.mxu1 %v665_v8 }
  0x50   :  { %618 = vmatpush3.bf16.msra.mxu0 %v665_v8  ;;  %651 = vmatpush3.bf16.msra.mxu1 %v665_v8 }
  0x51   :  { %619 = vmatprep.subr.bf16.mxu0 %v666_v9  ;;  %644 = vmatprep.subr.bf16.mxu1 %v666_v9 }
  0x54   :  { %620 = vmatpush3.bf16.msra.mxu0 %v666_v9  ;;  %652 = vmatpush3.bf16.msra.mxu1 %v666_v9 }
  0x57   :  { %622 = vmatmul.mubr.bf16.vlgmr.msra.gmra.mrb[0].mxu0 %v669_v10  ;;  %630 = vmatmul.mubr.bf16.vlgmr.msra.gmra.mrb[0].mxu1 %v670_v11 }
  0x58   :  { %625 = vmatprep.mubr.bf16.mxu0 %v671_v12  ;;  %633 = vmatprep.mubr.bf16.mxu1 %v672_v13 }
  0x5f   :  { %626 = vmatmul.mubr.bf16.gmra.mrb[4].mxu0 %v673_v14  ;;  %634 = vmatmul.mubr.bf16.gmra.mrb[4].mxu1 %v674_v15 }
 0x12a   :  { %v623_v29 = vpop.f32.mrb[0].mxu0  ;;  %v631_v30 = vpop.f32.mrb[0].mxu1 }
 0x12b   :  { %v238_v35 = vadd.f32 %v623_v29, %v855_v20  ;;  %v270_v36 = vadd.f32 %v631_v30, %v855_v20  ;;  %v229_v37 = vpop.f32.mrb[1].mxu0  ;;  %v261_v38 = vpop.f32.mrb[1].mxu1 }
 0x12c   :  { %v230_v41 = vadd.f32 %v855_v20, %v229_v37  ;;  %v262_v42 = vadd.f32 %v855_v20, %v261_v38  ;;  %v624_v43 = vpop.f32.mrb[2].mxu0  ;;  %v632_v44 = vpop.f32.mrb[2].mxu1 }
 0x12d   :  { %v294_v47 = vmax.f32 %v238_v35, 0.0  ;;  %v302_v48 = vmax.f32 %v270_v36, 0.0  ;;  %v241_v49 = vadd.f32 %v624_v43, %v855_v20  ;;  %v273_v50 = vadd.f32 %v632_v44, %v855_v20  ;;  %v232_v51 = vpop.f32.mrb[3].mxu0  ;;  %v264_v52 = vpop.f32.mrb[3].mxu1 }
 0x12e   :  { %v292_v53 = vmax.f32 %v230_v41, 0.0  ;;  %v300_v54 = vmax.f32 %v262_v42, 0.0  ;;  %v233_v55 = vadd.f32 %v855_v20, %v232_v51  ;;  %v265_v56 = vadd.f32 %v855_v20, %v264_v52 }
 0x12f   :  { %v295_v57 = vmax.f32 %v241_v49, 0.0  ;;  %v303_v58 = vmax.f32 %v273_v50, 0.0  ;;  %v342_v1 = vsub.f32 %v294_v47, %v509_v23  ;;  %v350_v2 = vsub.f32 %v302_v48, %v525_v24 }
 0x130   :  { %v293_v61 = vmax.f32 %v233_v55, 0.0  ;;  %v301_v62 = vmax.f32 %v265_v56, 0.0  ;;  %v340_v5 = vsub.f32 %v292_v53, %v505_v25  ;;  %v348_v6 = vsub.f32 %v300_v54, %v521_v26 }
 0x131   :  { %v343_v3 = vsub.f32 %v295_v57, %v510_v31  ;;  %v351_v4 = vsub.f32 %v303_v58, %v526_v32 }
 0x132   :  { %v341_v7 = vsub.f32 %v293_v61, %v506_v33  ;;  %v349_v8 = vsub.f32 %v301_v62, %v522_v34  ;;  %v627_v9 = vpop.f32.mrb[4].mxu0  ;;  %v635_v10 = vpop.f32.mrb[4].mxu1 }
 0x133   :  { %v543_v11 = vpack.c.bf16 %v343_v3, %v342_v1  ;;  %v563_v12 = vpack.c.bf16 %v351_v4, %v350_v2  ;;  %v254_v13 = vadd.f32 %v627_v9, %v855_v20  ;;  %v286_v14 = vadd.f32 %v635_v10, %v855_v20  ;;  %v245_v15 = vpop.f32.mrb[5].mxu0  ;;  %v277_v16 = vpop.f32.mrb[5].mxu1 }
 0x134   :  { %v538_v17 = vpack.c.bf16 %v341_v7, %v340_v5  ;;  %v558_v18 = vpack.c.bf16 %v349_v8, %v348_v6  ;;  %v246_v19 = vadd.f32 %v855_v20, %v245_v15  ;;  %v278_v23 = vadd.f32 %v855_v20, %v277_v16  ;;  %v628_v24 = vpop.f32.mrb[6].mxu0  ;;  %v636_v25 = vpop.f32.mrb[6].mxu1 }
 0x135   :  { %582 = vst [vmem:[#allocation8 + $0x8] sm:$0xff] %v543_v11   ;;  %586 = vst [vmem:[#allocation8 + $0x28] sm:$0xff] %v563_v12   ;;  %v298_v26 = vmax.f32 %v254_v13, 0.0  ;;  %v306_v29 = vmax.f32 %v286_v14, 0.0  ;;  %v257_v30 = vadd.f32 %v628_v24, %v855_v20  ;;  %v289_v31 = vadd.f32 %v636_v25, %v855_v20  ;;  %v248_v32 = vpop.f32.mrb[7].mxu0  ;;  %v280_v33 = vpop.f32.mrb[7].mxu1 }
 0x136   :  { %539 = vst [vmem:[#allocation8] sm:$0xff] %v538_v17   ;;  %585 = vst [vmem:[#allocation8 + $0x20] sm:$0xff] %v558_v18   ;;  %v296_v34 = vmax.f32 %v246_v19, 0.0  ;;  %v304_v35 = vmax.f32 %v278_v23, 0.0  ;;  %v249_v36 = vadd.f32 %v855_v20, %v248_v32  ;;  %v281_v37 = vadd.f32 %v855_v20, %v280_v33 }
 0x137   :  { %v299_v38 = vmax.f32 %v257_v30, 0.0  ;;  %v307_v41 = vmax.f32 %v289_v31, 0.0  ;;  %v346_v44 = vsub.f32 %v298_v26, %v517_v39  ;;  %v354_v47 = vsub.f32 %v306_v29, %v533_v40 }
 0x138   :  { %v297_v42 = vmax.f32 %v249_v36, 0.0  ;;  %v305_v43 = vmax.f32 %v281_v37, 0.0  ;;  %v344_v50 = vsub.f32 %v296_v34, %v513_v45  ;;  %v352_v20 = vsub.f32 %v304_v35, %v529_v46 }
 0x139   :  { %v347_v48 = vsub.f32 %v299_v38, %v518_v59  ;;  %v355_v49 = vsub.f32 %v307_v41, %v534_v60 }
 0x13a   :  { %v345_v51 = vsub.f32 %v297_v42, %v514_v63  ;;  %v353_v52 = vsub.f32 %v305_v43, %v530_v0 }
 0x13b   :  { %v553_v53 = vpack.c.bf16 %v347_v48, %v346_v44  ;;  %v573_v54 = vpack.c.bf16 %v355_v49, %v354_v47 }
 0x13c   :  { %v548_v55 = vpack.c.bf16 %v345_v51, %v344_v50  ;;  %v568_v21 = vpack.c.bf16 %v353_v52, %v352_v20 }
 0x13d   :  { %584 = vst [vmem:[#allocation8 + $0x18] sm:$0xff] %v553_v53   ;;  %588 = vst [vmem:[#allocation8 + $0x38] sm:$0xff] %v573_v54  }
 0x13e   :  { %583 = vst [vmem:[#allocation8 + $0x10] sm:$0xff] %v548_v55   ;;  %587 = vst [vmem:[#allocation8 + $0x30] sm:$0xff] %v568_v21  }
 0x13f   :  { %752 = shalt.err (!%p749_p0)
}
 0x140   :  { %s753_s6 = scalar_lea.hbm %s916_s4, 1024 }
 0x141   :  { %p754_p1 = scmp.ne.s32.totalorder %s916_s4, %s753_s6  ;;  %p757_p2 = scmp.lt.u32.totalorder %s753_s6, %s916_s4 }
 0x143   :  { %p759_p3 = pnand %p757_p2, %p754_p1 }
 0x145   :  { %762 = shalt.err (!%p759_p3)
}
 0x146   :  { %447 = dma.vmem_to_hbm [thread:$0]  %s442_s26, 1024, %s916_s4, [#allocation4], %s771_s27, %s771_s27, %s772_s28  }
 0x147   :  { %767 = dma.done.wait [#allocation4], 1024  }
 0x148   :  { %768 = vsyncadd [#allocation4], 4294966272 }
 0x149   :  { %451 = vsyncpa [#allocation3], 1 }
 0x14a   :  { %452 = vsyncpa [#allocation6], 1 }
 0x14b   :  { %453 = vsyncpa [#allocation4], 1 }

</bundles_post_ra>
